<compile_context>
chip_gen: v7x
topology: tpu7x:2x2x1
jax: 0.10.0
libtpu: 0.0.40
codegen_flags: <defaults>
</compile_context>

<pallas_src>
import functools

import jax
import jax.numpy as jnp
from jax.experimental import pallas as pl
from jax.experimental.pallas import tpu as pltpu


def _mlp_kernel(x_ref,
                w1_ref, b1_ref,
                w2_ref, b2_ref,
                w3_ref, b3_ref,
                w4_ref, b4_ref,
                o_ref):
    """One fused 4-layer MLP batch-tile in transposed (lane-dense) layout.

    x_ref : (S, Bt)   activations, batch on the lane axis
    wN    : (out, in) PyTorch-layout weights (f32 or bf16)
    bN    : (out, 1)  f32 biases, broadcast across lanes
    o_ref : (A, Bt)   lane-dense f32 output tile
    """
    x = x_ref[...]

    # Layer 1: Linear(S -> H) + ReLU   (f32 accumulation, f32 epilogue)
    h = jnp.dot(w1_ref[...], x, preferred_element_type=jnp.float32)
    h = jnp.maximum(h + b1_ref[...], 0.0)

    # Layer 2: Linear(H -> H) + ReLU
    h = jnp.dot(w2_ref[...], h.astype(w2_ref.dtype),
                preferred_element_type=jnp.float32)
    h = jnp.maximum(h + b2_ref[...], 0.0)

    # Layer 3: Linear(H -> H) + ReLU
    h = jnp.dot(w3_ref[...], h.astype(w3_ref.dtype),
                preferred_element_type=jnp.float32)
    h = jnp.maximum(h + b3_ref[...], 0.0)

    # Layer 4: Linear(H -> A), no activation
    h = jnp.dot(w4_ref[...], h.astype(w4_ref.dtype),
                preferred_element_type=jnp.float32)
    o_ref[...] = (h + b4_ref[...]).astype(o_ref.dtype)


def _pick_block_batch(B):
    """Largest lane-dense (multiple-of-128) batch tile that still gives a
    multi-step grid (pipelining + v7x dual-TC sharding). Tiny batches fall
    back to a single full-array tile."""
    for cand in (512, 256, 128):
        if B % cand == 0 and B // cand >= 2:
            return cand
    return B


@functools.partial(jax.jit, static_argnames=("block_batch", "compute_dtype"))
def network2_forward(x, params, *, block_batch=None, compute_dtype=jnp.float32):
    """Fused Pallas forward pass for Network_2.

    x:       (B, states) float32
    params:  dict with w1..w4 stored as (out, in) [PyTorch layout],
             b1..b4 stored as (out, 1), all float32.
    returns: (B, actions) float32
    """
    B, S = x.shape
    H = params["w1"].shape[0]
    A = params["w4"].shape[0]

    if block_batch is None:
        block_batch = _pick_block_batch(B)
    assert B % block_batch == 0
    grid = (B // block_batch,)

    # Transposed, lane-dense layout: batch on the lane (last) axis.
    xt = x.T.astype(compute_dtype)                 # (S, B)
    w1 = params["w1"].astype(compute_dtype)        # (H, S)
    w2 = params["w2"].astype(compute_dtype)        # (H, H)
    w3 = params["w3"].astype(compute_dtype)        # (H, H)
    w4 = params["w4"].astype(compute_dtype)        # (A, H)
    # Bias-add / ReLU epilogue stays in f32 (v5e VPU has no bf16 path).
    b1 = params["b1"].astype(jnp.float32)          # (H, 1)
    b2 = params["b2"].astype(jnp.float32)          # (H, 1)
    b3 = params["b3"].astype(jnp.float32)          # (H, 1)
    b4 = params["b4"].astype(jnp.float32)          # (A, 1)

    # Replicated blocks: block == full array dims (exempt from (8,128) rule).
    def rep(shape):
        return pl.BlockSpec(shape, lambda i: (0, 0))

    in_specs = [
        pl.BlockSpec((S, block_batch), lambda i: (0, i)),   # x tile (lane-dense)
        rep((H, S)), rep((H, 1)),                           # layer 1
        rep((H, H)), rep((H, 1)),                           # layer 2
        rep((H, H)), rep((H, 1)),                           # layer 3
        rep((A, H)), rep((A, 1)),                           # layer 4
    ]
    out_spec = pl.BlockSpec((A, block_batch), lambda i: (0, i))

    out_t = pl.pallas_call(
        _mlp_kernel,
        out_shape=jax.ShapeDtypeStruct((A, B), jnp.float32),
        grid_spec=pltpu.PrefetchScalarGridSpec(
            num_scalar_prefetch=0,
            grid=grid,
            in_specs=in_specs,
            out_specs=out_spec,
        ),
        compiler_params=pltpu.CompilerParams(
            dimension_semantics=("parallel",),
            vmem_limit_bytes=32 * 1024 * 1024),
    )(xt, w1, b1, w2, b2, w3, b3, w4, b4)

    return out_t.T                                  # (B, A) float32


def init_network2_params(key, states, actions, hidden):
    """Deterministic init mimicking nn.Linear default U(-1/sqrt(fan_in), +).

    Weights are stored in PyTorch layout (out, in); biases as (out, 1)."""
    dims = [(states, hidden), (hidden, hidden), (hidden, hidden), (hidden, actions)]
    params = {}
    for idx, (fan_in, fan_out) in enumerate(dims, start=1):
        key, kw, kb = jax.random.split(key, 3)
        bound = 1.0 / jnp.sqrt(jnp.float32(fan_in))
        params[f"w{idx}"] = jax.random.uniform(
            kw, (fan_out, fan_in), jnp.float32, -bound, bound)
        params[f"b{idx}"] = jax.random.uniform(
            kb, (fan_out, 1), jnp.float32, -bound, bound)
    return params


def network2_reference(x, params):
    """Plain-JAX reference of the same forward pass (f32)."""
    h = jnp.maximum(x @ params["w1"].T + params["b1"].T, 0.0)
    h = jnp.maximum(h @ params["w2"].T + params["b2"].T, 0.0)
    h = jnp.maximum(h @ params["w3"].T + params["b3"].T, 0.0)
    return h @ params["w4"].T + params["b4"].T


if __name__ == "__main__":
    # Small shapes implied by the module: states=16, hidden=32, actions=8.
    STATES, ACTIONS, HIDDEN = 16, 8, 32

    key = jax.random.PRNGKey(0)
    key, kx_small, kx_big = jax.random.split(key, 3)
    params = init_network2_params(key, STATES, ACTIONS, HIDDEN)

    # --- small-batch f32 check (single tile, exact semantics) ---------------
    x_small = jax.random.normal(kx_small, (8, STATES), jnp.float32)
    out_small = jax.block_until_ready(network2_forward(x_small, params))
    ref_small = network2_reference(x_small, params)
    assert out_small.shape == (8, ACTIONS)
    assert jnp.allclose(out_small, ref_small, atol=1e-5, rtol=1e-5)

    # --- larger-batch bf16 check (multi-step lane-dense grid, pipelined) ----
    x_big = jax.random.normal(kx_big, (512, STATES), jnp.float32)
    out_big = jax.block_until_ready(
        network2_forward(x_big, params, compute_dtype=jnp.bfloat16))
    ref_big = network2_reference(x_big, params)
    assert out_big.shape == (512, ACTIONS)
    assert jnp.allclose(out_big, ref_big, atol=5e-2, rtol=5e-2)

    print("KERNEL_OK")
</pallas_src>

<mosaic_0001>
module attributes {stable_mosaic.version = 11 : i64} {
  func.func @_mlp_kernel(%arg0: i32, %arg1: memref<16x8xf32, #tpu.memory_space<vmem>>, %arg2: memref<32x16xf32, #tpu.memory_space<vmem>>, %arg3: memref<32x1xf32, #tpu.memory_space<vmem>>, %arg4: memref<32x32xf32, #tpu.memory_space<vmem>>, %arg5: memref<32x1xf32, #tpu.memory_space<vmem>>, %arg6: memref<32x32xf32, #tpu.memory_space<vmem>>, %arg7: memref<32x1xf32, #tpu.memory_space<vmem>>, %arg8: memref<8x32xf32, #tpu.memory_space<vmem>>, %arg9: memref<8x1xf32, #tpu.memory_space<vmem>>, %arg10: memref<8x8xf32, #tpu.memory_space<vmem>>) attributes {dimension_semantics = [#tpu.dimension_semantics<parallel>], iteration_bounds = array<i64: 1>, scalar_prefetch = 0 : i64, scratch_operands = 0 : i64, tpu.core_type = #tpu.core_type<tc>, window_params = [{transform_indices = @transform_0, window_bounds = array<i64: 16, 8>}, {pipeline_mode = #tpu.pipeline_mode<synchronous>, transform_indices = @transform_1, window_bounds = array<i64: 32, 16>}, {pipeline_mode = #tpu.pipeline_mode<synchronous>, transform_indices = @transform_2, window_bounds = array<i64: 32, 1>}, {pipeline_mode = #tpu.pipeline_mode<synchronous>, transform_indices = @transform_3, window_bounds = array<i64: 32, 32>}, {pipeline_mode = #tpu.pipeline_mode<synchronous>, transform_indices = @transform_4, window_bounds = array<i64: 32, 1>}, {pipeline_mode = #tpu.pipeline_mode<synchronous>, transform_indices = @transform_5, window_bounds = array<i64: 32, 32>}, {pipeline_mode = #tpu.pipeline_mode<synchronous>, transform_indices = @transform_6, window_bounds = array<i64: 32, 1>}, {pipeline_mode = #tpu.pipeline_mode<synchronous>, transform_indices = @transform_7, window_bounds = array<i64: 8, 32>}, {pipeline_mode = #tpu.pipeline_mode<synchronous>, transform_indices = @transform_8, window_bounds = array<i64: 8, 1>}, {transform_indices = @transform_9, window_bounds = array<i64: 8, 8>}]} {
    %c0 = arith.constant 0 : index
    %c0_0 = arith.constant 0 : index
    %0 = vector.load %arg1[%c0, %c0_0] : memref<16x8xf32, #tpu.memory_space<vmem>>, vector<16x8xf32>
    %c0_1 = arith.constant 0 : index
    %c0_2 = arith.constant 0 : index
    %1 = vector.load %arg2[%c0_1, %c0_2] : memref<32x16xf32, #tpu.memory_space<vmem>>, vector<32x16xf32>
    %cst = arith.constant dense<0.000000e+00> : vector<32x8xf32>
    %2 = tpu.matmul %1, %0, %cst {dimension_numbers = #tpu.dot_dimension_numbers<[1], [0], [0], [1], [0, 0, 1, 1], [], []>} : vector<32x16xf32>, vector<16x8xf32>, vector<32x8xf32> -> vector<32x8xf32>
    %c0_3 = arith.constant 0 : index
    %c0_4 = arith.constant 0 : index
    %3 = vector.load %arg3[%c0_3, %c0_4] : memref<32x1xf32, #tpu.memory_space<vmem>>, vector<32x1xf32>
    %4 = vector.broadcast %3 : vector<32x1xf32> to vector<32x8xf32>
    %5 = arith.addf %2, %4 : vector<32x8xf32>
    %cst_5 = arith.constant 0.000000e+00 : f32
    %6 = vector.broadcast %cst_5 : f32 to vector<32x8xf32>
    %7 = arith.maximumf %5, %6 : vector<32x8xf32>
    %c0_6 = arith.constant 0 : index
    %c0_7 = arith.constant 0 : index
    %8 = vector.load %arg4[%c0_6, %c0_7] : memref<32x32xf32, #tpu.memory_space<vmem>>, vector<32x32xf32>
    %cst_8 = arith.constant dense<0.000000e+00> : vector<32x8xf32>
    %9 = tpu.matmul %8, %7, %cst_8 {dimension_numbers = #tpu.dot_dimension_numbers<[1], [0], [0], [1], [0, 0, 1, 1], [], []>} : vector<32x32xf32>, vector<32x8xf32>, vector<32x8xf32> -> vector<32x8xf32>
    %c0_9 = arith.constant 0 : index
    %c0_10 = arith.constant 0 : index
    %10 = vector.load %arg5[%c0_9, %c0_10] : memref<32x1xf32, #tpu.memory_space<vmem>>, vector<32x1xf32>
    %11 = vector.broadcast %10 : vector<32x1xf32> to vector<32x8xf32>
    %12 = arith.addf %9, %11 : vector<32x8xf32>
    %cst_11 = arith.constant 0.000000e+00 : f32
    %13 = vector.broadcast %cst_11 : f32 to vector<32x8xf32>
    %14 = arith.maximumf %12, %13 : vector<32x8xf32>
    %c0_12 = arith.constant 0 : index
    %c0_13 = arith.constant 0 : index
    %15 = vector.load %arg6[%c0_12, %c0_13] : memref<32x32xf32, #tpu.memory_space<vmem>>, vector<32x32xf32>
    %cst_14 = arith.constant dense<0.000000e+00> : vector<32x8xf32>
    %16 = tpu.matmul %15, %14, %cst_14 {dimension_numbers = #tpu.dot_dimension_numbers<[1], [0], [0], [1], [0, 0, 1, 1], [], []>} : vector<32x32xf32>, vector<32x8xf32>, vector<32x8xf32> -> vector<32x8xf32>
    %c0_15 = arith.constant 0 : index
    %c0_16 = arith.constant 0 : index
    %17 = vector.load %arg7[%c0_15, %c0_16] : memref<32x1xf32, #tpu.memory_space<vmem>>, vector<32x1xf32>
    %18 = vector.broadcast %17 : vector<32x1xf32> to vector<32x8xf32>
    %19 = arith.addf %16, %18 : vector<32x8xf32>
    %cst_17 = arith.constant 0.000000e+00 : f32
    %20 = vector.broadcast %cst_17 : f32 to vector<32x8xf32>
    %21 = arith.maximumf %19, %20 : vector<32x8xf32>
    %c0_18 = arith.constant 0 : index
    %c0_19 = arith.constant 0 : index
    %22 = vector.load %arg8[%c0_18, %c0_19] : memref<8x32xf32, #tpu.memory_space<vmem>>, vector<8x32xf32>
    %cst_20 = arith.constant dense<0.000000e+00> : vector<8x8xf32>
    %23 = tpu.matmul %22, %21, %cst_20 {dimension_numbers = #tpu.dot_dimension_numbers<[1], [0], [0], [1], [0, 0, 1, 1], [], []>} : vector<8x32xf32>, vector<32x8xf32>, vector<8x8xf32> -> vector<8x8xf32>
    %c0_21 = arith.constant 0 : index
    %c0_22 = arith.constant 0 : index
    %24 = vector.load %arg9[%c0_21, %c0_22] : memref<8x1xf32, #tpu.memory_space<vmem>>, vector<8x1xf32>
    %25 = vector.broadcast %24 : vector<8x1xf32> to vector<8x8xf32>
    %26 = arith.addf %23, %25 : vector<8x8xf32>
    %c0_23 = arith.constant 0 : index
    %c0_24 = arith.constant 0 : index
    %27 = vector.load %arg10[%c0_23, %c0_24] : memref<8x8xf32, #tpu.memory_space<vmem>>, vector<8x8xf32>
    tpu.vector_store %arg10[%c0_23, %c0_24], %26 {strides = array<i32>} : memref<8x8xf32, #tpu.memory_space<vmem>>, vector<8x8xf32>,
    return
  }
  func.func @transform_0(%arg0: i32) -> (i32, i32) {
    %c0_i32 = arith.constant 0 : i32
    %c0_i32_0 = arith.constant 0 : i32
    return %c0_i32, %arg0 : i32, i32
  }
  func.func @transform_1(%arg0: i32) -> (i32, i32) {
    %c0_i32 = arith.constant 0 : i32
    %c0_i32_0 = arith.constant 0 : i32
    %c0_i32_1 = arith.constant 0 : i32
    return %c0_i32, %c0_i32_0 : i32, i32
  }
  func.func @transform_2(%arg0: i32) -> (i32, i32) {
    %c0_i32 = arith.constant 0 : i32
    %c0_i32_0 = arith.constant 0 : i32
    %c0_i32_1 = arith.constant 0 : i32
    return %c0_i32, %c0_i32_0 : i32, i32
  }
  func.func @transform_3(%arg0: i32) -> (i32, i32) {
    %c0_i32 = arith.constant 0 : i32
    %c0_i32_0 = arith.constant 0 : i32
    %c0_i32_1 = arith.constant 0 : i32
    return %c0_i32, %c0_i32_0 : i32, i32
  }
  func.func @transform_4(%arg0: i32) -> (i32, i32) {
    %c0_i32 = arith.constant 0 : i32
    %c0_i32_0 = arith.constant 0 : i32
    %c0_i32_1 = arith.constant 0 : i32
    return %c0_i32, %c0_i32_0 : i32, i32
  }
  func.func @transform_5(%arg0: i32) -> (i32, i32) {
    %c0_i32 = arith.constant 0 : i32
    %c0_i32_0 = arith.constant 0 : i32
    %c0_i32_1 = arith.constant 0 : i32
    return %c0_i32, %c0_i32_0 : i32, i32
  }
  func.func @transform_6(%arg0: i32) -> (i32, i32) {
    %c0_i32 = arith.constant 0 : i32
    %c0_i32_0 = arith.constant 0 : i32
    %c0_i32_1 = arith.constant 0 : i32
    return %c0_i32, %c0_i32_0 : i32, i32
  }
  func.func @transform_7(%arg0: i32) -> (i32, i32) {
    %c0_i32 = arith.constant 0 : i32
    %c0_i32_0 = arith.constant 0 : i32
    %c0_i32_1 = arith.constant 0 : i32
    return %c0_i32, %c0_i32_0 : i32, i32
  }
  func.func @transform_8(%arg0: i32) -> (i32, i32) {
    %c0_i32 = arith.constant 0 : i32
    %c0_i32_0 = arith.constant 0 : i32
    %c0_i32_1 = arith.constant 0 : i32
    return %c0_i32, %c0_i32_0 : i32, i32
  }
  func.func @transform_9(%arg0: i32) -> (i32, i32) {
    %c0_i32 = arith.constant 0 : i32
    %c0_i32_0 = arith.constant 0 : i32
    return %c0_i32, %arg0 : i32, i32
  }
}

</mosaic_0001>

<bundles_post_ra>
// kernel: network2_forward.1
= control target key start
LH: loop header
LB: loop body
LE: loop exit
PB: predicated region body
PF: predicated region fallthrough
CT: control target
= control target key end

     0   :  { %vm62_vm0 = vcmask 130048   ;;  %v630_v3 = vmov 0   ;;  %vm192_vm1 = vcmask 261120   ;;  %vm632_vm2 = vmmov 0   ;;  %s784_s0 = inlined_call_operand.vmem [shape: f32[16,8], index: 0, kind: input, shape index: {}]   ;;  %s785_s1 = inlined_call_operand.vmem [shape: f32[32,16], index: 1, kind: input, shape index: {}]   ;;  %s786_s2 = inlined_call_operand.vmem [shape: f32[32,1], index: 2, kind: input, shape index: {}]   ;;  %s787_s4 = inlined_call_operand.vmem [shape: f32[32,1], index: 4, kind: input, shape index: {}]   ;;  %s788_s6 = inlined_call_operand.vmem [shape: f32[32,1], index: 6, kind: input, shape index: {}]   ;;  %s789_s8 = inlined_call_operand.vmem [shape: f32[8,1], index: 8, kind: input, shape index: {}]   ;;  %s790_s3 = inlined_call_operand.vmem [shape: f32[32,32], index: 3, kind: input, shape index: {}]   ;;  %s791_s5 = inlined_call_operand.vmem [shape: f32[32,32], index: 5, kind: input, shape index: {}]   ;;  %s792_s7 = inlined_call_operand.vmem [shape: f32[8,32], index: 7, kind: input, shape index: {}]   ;;  %s793_s9 = inlined_call_operand.vmem [shape: f32[8,8], index: 9, kind: output, shape index: {}]  }
   0x1   :  { %v32_v0 = vld [vmem:[%s784_s0] sm:$0xff]  ;;  %v33_v1 = vld [vmem:[%s784_s0 + $0x8] sm:$0xff]  ;;  %628 = vset.pattern.permute.xlu0 %v630_v3  ;;  %629 = vset.pattern.permute.xlu1 %v630_v3  ;;  %v40_v6 = vld [vmem:[%s786_s2 + $0x10] sm:$0xff]  ;;  %vm503_vm3 = vcmask 64512  }
   0x2   :  { %v34_v2 = vld [vmem:[%s785_s1] sm:$0xff]  ;;  %v598_v4 = vpack.c.bf16 %v33_v1, %v32_v0  ;;  %v35_v7 = vld [vmem:[%s785_s1 + $0x8] sm:$0xff]  ;;  %54 = vperm.xlu1 %629, %v40_v6   ;;  %v36_v9 = vld [vmem:[%s785_s1 + $0x10] sm:$0xff]  ;;  %v631_v1 = vmov 0.0|0.0  }
   0x3   :  { %553 = vmatprep.mubr.msk.f32.mxu0 %vm62_vm0, %v34_v2  ;;  %v38_v5 = vld [vmem:[%s786_s2] sm:$0xff]  ;;  %v39_v8 = vld [vmem:[%s786_s2 + $0x8] sm:$0xff]  ;;  %v41_v10 = vld [vmem:[%s786_s2 + $0x18] sm:$0xff]  ;;  %v633_v2 = vmov 0.0  }
   0x4   :  { %599 = vmatprep.subr.bf16.mxu0 %v598_v4  ;;  %44 = vperm.xlu0 %628, %v38_v5   ;;  %v37_v11 = vld [vmem:[%s785_s1 + $0x18] sm:$0xff]  ;;  %v168_v12 = vld [vmem:[%s787_s4] sm:$0xff]  ;;  %v169_v13 = vld [vmem:[%s787_s4 + $0x8] sm:$0xff] }
   0x5   :  { %601 = vmatpush3.bf16.msra.mxu0 %v598_v4  ;;  %v170_v14 = vld [vmem:[%s787_s4 + $0x10] sm:$0xff]  ;;  %v171_v15 = vld [vmem:[%s787_s4 + $0x18] sm:$0xff]  ;;  %v298_v16 = vld [vmem:[%s788_s6] sm:$0xff] }
   0x6   :  { %59 = vperm.xlu1 %629, %v41_v10   ;;  %v299_v17 = vld [vmem:[%s788_s6 + $0x8] sm:$0xff]  ;;  %v300_v18 = vld [vmem:[%s788_s6 + $0x10] sm:$0xff]  ;;  %v301_v19 = vld [vmem:[%s788_s6 + $0x18] sm:$0xff] }
   0x7   :  { %v424_v20 = vld [vmem:[%s789_s8] sm:$0xff]  ;;  %v165_v40 = vld [vmem:[%s790_s3 + $0x8] sm:$0xff]  ;;  %v166_v41 = vld [vmem:[%s790_s3 + $0x10] sm:$0xff] }
   0x8   :  { %554 = vmatmul.mubr.msk.f32.vlgmr.msra.gmra.mrb[0].mxu0 %vm62_vm0, %v35_v7  ;;  %49 = vperm.xlu0 %628, %v39_v8   ;;  %v164_v21 = vld [vmem:[%s790_s3] sm:$0xff]  ;;  %v167_v42 = vld [vmem:[%s790_s3 + $0x18] sm:$0xff]  ;;  %v295_v62 = vld [vmem:[%s791_s5 + $0x8] sm:$0xff] }
   0x9   :  { %556 = vmatprep.mubr.msk.f32.mxu0 %vm62_vm0, %v36_v9  ;;  %567 = vmatprep.mubr.msk.f32.mxu1 %vm192_vm1, %v164_v21  ;;  %v294_v43 = vld [vmem:[%s791_s5] sm:$0xff]  ;;  %v296_v63 = vld [vmem:[%s791_s5 + $0x10] sm:$0xff]  ;;  %v297_v0 = vld [vmem:[%s791_s5 + $0x18] sm:$0xff] }
   0xa   :  { %179 = vperm.xlu1 %629, %v169_v13   ;;  %v423_v21 = vld [vmem:[%s792_s7] sm:$0xff] }
   0xc   :  { %557 = vmatmul.mubr.msk.f32.gmra.mrb[2].mxu0 %vm62_vm0, %v37_v11  ;;  %174 = vperm.xlu0 %628, %v168_v12  }
   0xd   :  { %581 = vmatprep.mubr.msk.f32.mxu0 %vm192_vm1, %v294_v43 }
   0xe   :  { %189 = vperm.xlu1 %629, %v171_v15  }
  0x10   :  { %184 = vperm.xlu0 %628, %v170_v14  }
  0x12   :  { %309 = vperm.xlu1 %629, %v299_v17  }
  0x14   :  { %304 = vperm.xlu0 %628, %v298_v16  }
  0x16   :  { %319 = vperm.xlu1 %629, %v301_v19  }
  0x18   :  { %314 = vperm.xlu0 %628, %v300_v18  }
  0x1c   :  { %427 = vperm.xlu0 %628, %v424_v20  }
  0x81   :  { %v55_v23 = vpop.permute.xlu1 %54 }
  0x83   :  { %v45_v22 = vpop.permute.xlu0 %44 }
  0x85   :  { %v60_v30 = vpop.permute.xlu1 %59 }
  0x87   :  { %v50_v24 = vpop.permute.xlu0 %49 }
  0x89   :  { %v180_v44 = vpop.permute.xlu1 %179 }
  0x8b   :  { %v175_v45 = vpop.permute.xlu0 %174 }
  0x8d   :  { %v190_v51 = vpop.permute.xlu1 %189 }
  0x8f   :  { %v185_v54 = vpop.permute.xlu0 %184 }
  0x91   :  { %v310_v3 = vpop.permute.xlu1 %309 }
  0x93   :  { %v305_v4 = vpop.permute.xlu0 %304 }
  0x95   :  { %v320_v10 = vpop.permute.xlu1 %319 }
  0x97   :  { %v315_v13 = vpop.permute.xlu0 %314 }
  0xdb   :  { %v555_v25 = vpop.f32.mrb[0].mxu0 }
  0xdc   :  { %v147_v26 = vadd.f32 %v555_v25, %v50_v24  ;;  %v141_v27 = vpop.f32.mrb[1].mxu0 }
  0xdd   :  { %v142_v28 = vadd.f32 %v141_v27, %v45_v22  ;;  %v428_v22 = vpop.permute.xlu0 %427 }
  0xde   :  { %v161_v29 = vmax.f32 %v147_v26, 0.0 }
  0xdf   :  { %v160_v31 = vmax.f32 %v142_v28, 0.0  ;;  %v558_v32 = vpop.f32.mrb[2].mxu0 }
  0xe0   :  { %v157_v33 = vadd.f32 %v558_v32, %v60_v30  ;;  %v151_v34 = vpop.f32.mrb[3].mxu0 }
  0xe1   :  { %v152_v35 = vadd.f32 %v151_v34, %v55_v23  ;;  %v602_v36 = vpack.c.bf16 %v161_v29, %v160_v31 }
  0xe2   :  { %v163_v37 = vmax.f32 %v157_v33, 0.0 }
  0xe3   :  { %v162_v38 = vmax.f32 %v152_v35, 0.0  ;;  %603 = vmatprep.subr.bf16.mxu1 %v602_v36 }
  0xe4   :  { %605 = vmatpush3.bf16.msra.mxu1 %v602_v36 }
  0xe5   :  { %v606_v39 = vpack.c.bf16 %v163_v37, %v162_v38 }
  0xe7   :  { %607 = vmatprep.subr.bf16.mxu1 %v606_v39 }
  0xe8   :  { %609 = vmatpush3.bf16.msra.mxu1 %v606_v39 }
  0xe9   :  { %618 = vmatprep.subr.bf16.mxu1 %v631_v1 }
  0xeb   :  { %568 = vmatmul.mubr.msk.f32.vlgmr.msra.gmra.mrb[0].mxu1 %vm192_vm1, %v165_v40 }
  0xec   :  { %570 = vmatprep.mubr.msk.f32.mxu1 %vm192_vm1, %v166_v41 }
  0xef   :  { %571 = vmatmul.mubr.msk.f32.gmra.mrb[2].mxu1 %vm192_vm1, %v167_v42 }
  0xf0   :  { %595 = vmatprep.mubr.msk.f32.mxu1 %vm632_vm2, %v633_v2 }
 0x1be   :  { %v569_v46 = vpop.f32.mrb[0].mxu1 }
 0x1bf   :  { %v277_v47 = vadd.f32 %v569_v46, %v180_v44  ;;  %v271_v48 = vpop.f32.mrb[1].mxu1 }
 0x1c0   :  { %v272_v49 = vadd.f32 %v271_v48, %v175_v45 }
 0x1c1   :  { %v291_v50 = vmax.f32 %v277_v47, 0.0 }
 0x1c2   :  { %v290_v52 = vmax.f32 %v272_v49, 0.0  ;;  %v572_v53 = vpop.f32.mrb[2].mxu1 }
 0x1c3   :  { %v287_v55 = vadd.f32 %v572_v53, %v190_v51  ;;  %v281_v56 = vpop.f32.mrb[3].mxu1 }
 0x1c4   :  { %v610_v57 = vpack.c.bf16 %v291_v50, %v290_v52  ;;  %v282_v58 = vadd.f32 %v281_v56, %v185_v54 }
 0x1c5   :  { %v293_v59 = vmax.f32 %v287_v55, 0.0 }
 0x1c6   :  { %v292_v60 = vmax.f32 %v282_v58, 0.0  ;;  %611 = vmatprep.subr.bf16.mxu0 %v610_v57 }
 0x1c7   :  { %613 = vmatpush3.bf16.msra.mxu0 %v610_v57 }
 0x1c8   :  { %v614_v61 = vpack.c.bf16 %v293_v59, %v292_v60 }
 0x1ca   :  { %615 = vmatprep.subr.bf16.mxu0 %v614_v61 }
 0x1cb   :  { %617 = vmatpush3.bf16.msra.mxu0 %v614_v61 }
 0x1ce   :  { %582 = vmatmul.mubr.msk.f32.vlgmr.msra.gmra.mrb[4].mxu0 %vm192_vm1, %v295_v62 }
 0x1cf   :  { %584 = vmatprep.mubr.msk.f32.mxu0 %vm192_vm1, %v296_v63 }
 0x1d2   :  { %585 = vmatmul.mubr.msk.f32.gmra.mrb[6].mxu0 %vm192_vm1, %v297_v0 }
 0x2a1   :  { %v583_v5 = vpop.f32.mrb[4].mxu0 }
 0x2a2   :  { %v406_v6 = vadd.f32 %v583_v5, %v310_v3  ;;  %v400_v7 = vpop.f32.mrb[5].mxu0 }
 0x2a3   :  { %v401_v8 = vadd.f32 %v400_v7, %v305_v4 }
 0x2a4   :  { %v420_v9 = vmax.f32 %v406_v6, 0.0 }
 0x2a5   :  { %v419_v11 = vmax.f32 %v401_v8, 0.0  ;;  %v586_v12 = vpop.f32.mrb[6].mxu0 }
 0x2a6   :  { %v416_v14 = vadd.f32 %v586_v12, %v320_v10  ;;  %v410_v15 = vpop.f32.mrb[7].mxu0 }
 0x2a7   :  { %v619_v16 = vpack.c.bf16 %v420_v9, %v419_v11  ;;  %v411_v17 = vadd.f32 %v410_v15, %v315_v13 }
 0x2a8   :  { %v422_v18 = vmax.f32 %v416_v14, 0.0 }
 0x2a9   :  { %v421_v19 = vmax.f32 %v411_v17, 0.0  ;;  %620 = vmatpush3.bf16.msra.mxu1 %v619_v16 }
 0x2aa   :  { %621 = vmatprep.subr.bf16.mxu1 %v631_v1 }
 0x2ab   :  { %v622_v20 = vpack.c.bf16 %v422_v18, %v421_v19 }
 0x2ad   :  { %623 = vmatpush3.bf16.msra.mxu1 %v622_v20 }
 0x2b0   :  { %596 = vmatmul.mubr.msk.f32.vlgmr.msra.gmra.mrb[4].mxu1 %vm192_vm1, %v423_v21 }
 0x383   :  { %v499_v23 = vpop.f32.mrb[4].mxu1 }
 0x384   :  { %v500_v24 = vadd.f32 %v499_v23, %v428_v22  ;;  %v597_v25 = vpop.f32.mrb[5].mxu1 }
 0x386   :  { %504 = vst.msk [vmem:[%s793_s9] sm:$0xff] %vm503_vm3, %v500_v24 }

</bundles_post_ra>
